<compile_context>
chip_gen: v6e
topology: v6e:2x2x1
jax: 0.10.0
libtpu: 0.0.40
codegen_flags: <defaults>
</compile_context>

<pallas_src>
import jax
import jax.numpy as jnp
from jax.experimental import pallas as pl
from jax.experimental.pallas import tpu as pltpu


def _femloss_kernel(zk_ref, m_ref, zj_ref, qf_ref, zm_acc):
    # zk_ref : (b_pad, tk)    f32   k-slice of z (columns k*tk .. k*tk+tk)
    # m_ref  : (tk, ncols)    f32   full-row tile of this core's column group
    # zj_ref : (b_pad, ncols) f32   this core's column group of z (constant block)
    # qf_ref : (1, b_pad)     f32   per-batch partial quadratic form (this group)
    # zm_acc : (b_pad, ncols) f32   running z @ M[:, group] accumulator
    k = pl.program_id(1)
    nk = pl.num_programs(1)

    @pl.when(k == 0)
    def _init():
        zm_acc[...] = jnp.zeros_like(zm_acc)

    # zm[:, group] += z[:, k-tile] @ M[k-tile, group]
    zm_acc[...] += jnp.dot(zk_ref[...], m_ref[...],
                           preferred_element_type=jnp.float32)

    @pl.when(k == nk - 1)
    def _finalize():
        qf = jnp.sum(zj_ref[...] * zm_acc[...], axis=-1)        # (b_pad,)
        qf_ref[...] = qf[None, :].astype(qf_ref.dtype)


def _vmem_capacity_bytes():
    try:
        return int(pltpu.get_tpu_info().vmem_capacity_bytes)
    except Exception:
        return 64 * 1024 * 1024   # conservative: v7x has 64 MiB per TensorCore


def _pick_row_tile(n, ncols, m_tile_budget):
    """Rows per full-row (tk, ncols) M tile: biggest that fits the budget."""
    bytes_per_row = ncols * 4
    tk_cap = m_tile_budget // bytes_per_row
    if n <= tk_cap:
        return n                                   # whole M in one row block
    tk_cap = max(128, (tk_cap // 128) * 128)       # lane-aligned z k-slices
    best = 0
    d = 1
    while d * d <= n:                              # prefer a divisor: no padding
        if n % d == 0:
            for t in (d, n // d):
                if t <= tk_cap and t % 128 == 0 and t > best:
                    best = t
        d += 1
    if best:
        return best
    return tk_cap                                  # caller zero-pads M rows / z cols


def femloss(m, z, *, tk=None):
    """m: (N, N) f32 dense mass matrix; z: (B, N). Returns scalar f32 loss."""
    n = m.shape[0]
    b = z.shape[0]
    assert m.shape == (n, n) and z.shape == (b, n)

    m = m.astype(jnp.float32)
    z = z.astype(jnp.float32)

    # Pad batch to a full f32 sublane group (8 rows); zero rows are inert.
    b_pad = max(8, ((b + 7) // 8) * 8)
    z_f = jnp.zeros((b_pad, n), jnp.float32).at[:b, :].set(z)

    # Column-group split: leading "parallel" grid axis -> both TensorCores on
    # v7x stream disjoint column halves of M; cheap serial step elsewhere.
    n_split = 2 if (n % 256 == 0 and n >= 1024) else 1
    ncols = n // n_split

    cap = _vmem_capacity_bytes()
    # Double-buffered M tiles use <= ~2/5 of VMEM, capped at 16 MiB per tile
    # (safe on v7x's 64 MiB even if the capacity query is per-chip).
    m_tile_budget = min(cap // 5, 16 << 20)
    if tk is None:
        tk = _pick_row_tile(n, ncols, m_tile_budget)
    else:
        tk = min(int(tk), n)
    if tk < n and tk % 128 != 0:
        raise ValueError("tk must be a multiple of 128 (lane-aligned z slices) or >= N")

    # Awkward-N guard: zero-pad M rows / z columns up to a multiple of tk.
    np_rows = ((n + tk - 1) // tk) * tk
    if np_rows != n:
        m_in = jnp.zeros((np_rows, n), jnp.float32).at[:n, :].set(m)
        z_k_in = jnp.zeros((b_pad, np_rows), jnp.float32).at[:, :n].set(z_f)
    else:
        m_in = m
        z_k_in = z_f
    nk = np_rows // tk

    m_tile_bytes = tk * ncols * 4
    need = (2 * m_tile_bytes            # double-buffered M row tiles
            + 2 * b_pad * tk * 4        # double-buffered z k-slices
            + 2 * b_pad * ncols * 4     # z column group (constant block)
            + b_pad * ncols * 4         # zm accumulator scratch
            + 2 * n_split * b_pad * 4)  # tiny output
    vmem_limit = int(min(max(need + (4 << 20), 32 << 20), 112 << 20))

    qf_parts = pl.pallas_call(
        _femloss_kernel,
        out_shape=jax.ShapeDtypeStruct((n_split, b_pad), jnp.float32),
        grid=(n_split, nk),
        in_specs=[
            # z k-slices streamed alongside the matching M row tile.
            pl.BlockSpec((b_pad, tk), lambda j, k: (0, k)),
            # M full-row tiles for this core's column group: large contiguous DMAs.
            pl.BlockSpec((tk, ncols), lambda j, k: (k, j)),
            # z column group for the finalize elementwise product (constant block).
            pl.BlockSpec((b_pad, ncols), lambda j, k: (0, j)),
        ],
        out_specs=pl.BlockSpec((1, b_pad), lambda j, k: (j, 0)),
        scratch_shapes=[pltpu.VMEM((b_pad, ncols), jnp.float32)],
        compiler_params=pltpu.CompilerParams(
            dimension_semantics=("parallel", "arbitrary"),
            vmem_limit_bytes=vmem_limit,
        ),
        cost_estimate=pl.CostEstimate(
            flops=2 * b_pad * np_rows * n,
            transcendentals=0,
            bytes_accessed=4 * (np_rows * n + 2 * b_pad * np_rows
                                + n_split * b_pad),
        ),
    )(z_k_in, m_in, z_f)

    # Combine per-core partials, clamp tiny negative f32 rounding, sqrt, mean.
    qf = jnp.sum(qf_parts, axis=0)[:b]
    err = jnp.sqrt(jnp.maximum(qf, 0.0))
    return jnp.mean(err)


def femloss_ref(m, z):
    mz = m @ z.T
    err = jnp.sqrt(jnp.sum(z.T * mz, axis=0))
    return jnp.mean(err)


def _make_spd(key, n):
    a = jax.random.normal(key, (n, n), dtype=jnp.float32)
    return (a @ a.T) / n + 0.1 * jnp.eye(n, dtype=jnp.float32)


if __name__ == "__main__":
    key = jax.random.PRNGKey(0)
    k_m, k_z, k_m2, k_z2 = jax.random.split(key, 4)

    # Small shape consistent with the module: z (B, N), M (N, N).
    B, N = 4, 32
    m = _make_spd(k_m, N)
    z = jax.random.normal(k_z, (B, N), dtype=jnp.float32)
    out = jax.block_until_ready(femloss(m, z))
    ref = jax.block_until_ready(femloss_ref(m, z))
    assert jnp.allclose(out, ref, rtol=1e-5, atol=1e-5), (out, ref)

    # Larger shape exercising the multi-row-tile reduction (nk = 4) and the
    # two-column-group "parallel" axis, with a non-multiple-of-8 batch.
    B2, N2 = 3, 1024
    m2 = _make_spd(k_m2, N2)
    z2 = jax.random.normal(k_z2, (B2, N2), dtype=jnp.float32)
    out2 = jax.block_until_ready(femloss(m2, z2, tk=256))
    ref2 = jax.block_until_ready(femloss_ref(m2, z2))
    assert jnp.allclose(out2, ref2, rtol=1e-4, atol=1e-5), (out2, ref2)

    print("KERNEL_OK")
</pallas_src>

<mosaic_0001>
module attributes {stable_mosaic.version = 11 : i64} {
  func.func @_femloss_kernel(%arg0: i32, %arg1: i32, %arg2: memref<8x32xf32, #tpu.memory_space<vmem>>, %arg3: memref<32x32xf32, #tpu.memory_space<vmem>>, %arg4: memref<8x32xf32, #tpu.memory_space<vmem>>, %arg5: memref<1x8xf32, #tpu.memory_space<vmem>>, %arg6: memref<8x32xf32, #tpu.memory_space<vmem>>) attributes {dimension_semantics = [#tpu.dimension_semantics<parallel>, #tpu.dimension_semantics<arbitrary>], iteration_bounds = array<i64: 1, 1>, scalar_prefetch = 0 : i64, scratch_operands = 1 : i64, tpu.core_type = #tpu.core_type<tc>, window_params = [{transform_indices = @transform_0, window_bounds = array<i64: 8, 32>}, {transform_indices = @transform_1, window_bounds = array<i64: 32, 32>}, {transform_indices = @transform_2, window_bounds = array<i64: 8, 32>}, {transform_indices = @transform_3, window_bounds = array<i64: 1, 8>}]} {
    %c0_i32 = arith.constant 0 : i32
    %0 = arith.cmpi eq, %arg1, %c0_i32 : i32
    %1 = arith.extui %0 : i1 to i32
    %c0_i32_0 = arith.constant 0 : i32
    %2 = arith.cmpi ne, %1, %c0_i32_0 : i32
    scf.if %2 {
      %cst_10 = arith.constant 0.000000e+00 : f32
      %12 = vector.broadcast %cst_10 : f32 to vector<8x32xf32>
      %c0_11 = arith.constant 0 : index
      %c0_12 = arith.constant 0 : index
      %13 = vector.load %arg6[%c0_11, %c0_12] : memref<8x32xf32, #tpu.memory_space<vmem>>, vector<8x32xf32>
      tpu.vector_store %arg6[%c0_11, %c0_12], %12 {strides = array<i32>} : memref<8x32xf32, #tpu.memory_space<vmem>>, vector<8x32xf32>,
    } else {
    }
    %c0 = arith.constant 0 : index
    %c0_1 = arith.constant 0 : index
    %3 = vector.load %arg6[%c0, %c0_1] : memref<8x32xf32, #tpu.memory_space<vmem>>, vector<8x32xf32>
    %c0_2 = arith.constant 0 : index
    %c0_3 = arith.constant 0 : index
    %4 = vector.load %arg2[%c0_2, %c0_3] : memref<8x32xf32, #tpu.memory_space<vmem>>, vector<8x32xf32>
    %c0_4 = arith.constant 0 : index
    %c0_5 = arith.constant 0 : index
    %5 = vector.load %arg3[%c0_4, %c0_5] : memref<32x32xf32, #tpu.memory_space<vmem>>, vector<32x32xf32>
    %cst = arith.constant dense<0.000000e+00> : vector<8x32xf32>
    %6 = tpu.matmul %4, %5, %cst {dimension_numbers = #tpu.dot_dimension_numbers<[1], [0], [0], [1], [0, 0, 1, 1], [], []>} : vector<8x32xf32>, vector<32x32xf32>, vector<8x32xf32> -> vector<8x32xf32>
    %7 = arith.addf %3, %6 : vector<8x32xf32>
    %c0_6 = arith.constant 0 : index
    %c0_7 = arith.constant 0 : index
    %8 = vector.load %arg6[%c0_6, %c0_7] : memref<8x32xf32, #tpu.memory_space<vmem>>, vector<8x32xf32>
    tpu.vector_store %arg6[%c0_6, %c0_7], %7 {strides = array<i32>} : memref<8x32xf32, #tpu.memory_space<vmem>>, vector<8x32xf32>,
    %c0_i32_8 = arith.constant 0 : i32
    %9 = arith.cmpi eq, %arg1, %c0_i32_8 : i32
    %10 = arith.extui %9 : i1 to i32
    %c0_i32_9 = arith.constant 0 : i32
    %11 = arith.cmpi ne, %10, %c0_i32_9 : i32
    scf.if %11 {
      %c0_10 = arith.constant 0 : index
      %c0_11 = arith.constant 0 : index
      %12 = vector.load %arg4[%c0_10, %c0_11] : memref<8x32xf32, #tpu.memory_space<vmem>>, vector<8x32xf32>
      %c0_12 = arith.constant 0 : index
      %c0_13 = arith.constant 0 : index
      %13 = vector.load %arg6[%c0_12, %c0_13] : memref<8x32xf32, #tpu.memory_space<vmem>>, vector<8x32xf32>
      %14 = arith.mulf %12, %13 : vector<8x32xf32>
      %cst_14 = arith.constant dense<0.000000e+00> : vector<8xf32>
      %15 = vector.multi_reduction <add>, %14, %cst_14 [1] : vector<8x32xf32> to vector<8xf32>
      %16 = vector.shape_cast %15 : vector<8xf32> to vector<1x8xf32>
      %c0_15 = arith.constant 0 : index
      %c0_16 = arith.constant 0 : index
      %17 = vector.load %arg5[%c0_15, %c0_16] : memref<1x8xf32, #tpu.memory_space<vmem>>, vector<1x8xf32>
      tpu.vector_store %arg5[%c0_15, %c0_16], %16 {strides = array<i32>} : memref<1x8xf32, #tpu.memory_space<vmem>>, vector<1x8xf32>,
    } else {
    }
    return
  }
  func.func @transform_0(%arg0: i32, %arg1: i32) -> (i32, i32) {
    %c0_i32 = arith.constant 0 : i32
    %c0_i32_0 = arith.constant 0 : i32
    return %c0_i32, %arg1 : i32, i32
  }
  func.func @transform_1(%arg0: i32, %arg1: i32) -> (i32, i32) {
    %c0_i32 = arith.constant 0 : i32
    return %arg1, %arg0 : i32, i32
  }
  func.func @transform_2(%arg0: i32, %arg1: i32) -> (i32, i32) {
    %c0_i32 = arith.constant 0 : i32
    %c0_i32_0 = arith.constant 0 : i32
    return %c0_i32, %arg0 : i32, i32
  }
  func.func @transform_3(%arg0: i32, %arg1: i32) -> (i32, i32) {
    %c0_i32 = arith.constant 0 : i32
    %c0_i32_0 = arith.constant 0 : i32
    return %arg0, %c0_i32 : i32, i32
  }
}

</mosaic_0001>

<bundles_post_ra>
// kernel: tpu_custom_call.1
= control target key start
LH: loop header
LB: loop body
LE: loop exit
PB: predicated region body
PF: predicated region fallthrough
CT: control target
= control target key end

     0   :  { %8 = vsyncpa [#allocation4], 0  ;;  %s330_s0 = inlined_call_operand.hbm [shape: f32[8,32], index: 0, kind: input, shape index: {}]   ;;  %s331_s1 = inlined_call_operand.hbm [shape: f32[32,32], index: 1, kind: input, shape index: {}]   ;;  %s332_s2 = inlined_call_operand.hbm [shape: f32[8,32], index: 2, kind: input, shape index: {}]   ;;  %s333_s3 = inlined_call_operand.hbm [shape: f32[1,8], index: 3, kind: output, shape index: {}]  }
   0x1   :  { %9 = vsyncpa [#allocation7], 0 }
   0x2   :  { %10 = vsyncpa [#allocation5], 0  ;;  %s286_s12 = smov [#allocation6]  }
   0x3   :  { %s26_s13 = sshll.u32 %s286_s12, 4  ;;  %s27_s13 = int_to_ptr.vmem [resolvable:$true] %s26_s13 }
   0x4   :  { %s208_s14 = scalar_lea.vmem %s27_s13, 512  ;;  %p213_p1 = scmp.lt.s32.totalorder %s27_s13, %s27_s13 }
   0x5   :  { %p209_p0 = scmp.ne.s32.totalorder %s27_s13, %s208_s14  ;;  %p214_p2 = scmp.lt.s32.totalorder %s208_s14, %s208_s14 }
   0x7   :  { %p215_p3 = por %p214_p2, %p213_p1 }
   0x9   :  { %p216_p4 = pnand %p215_p3, %p209_p0 }
   0xb   :  { %219 = shalt.err (!%p216_p4)
}
   0xc   :  { %s287_s15 = smov 128   ;;  %s288_s16 = smov 8  }
   0xd   :  { %32 = dma.hbm_to_vmem [thread:$0]  %s331_s1, 512, %s27_s13, [#allocation7], %s287_s15, %s287_s15, %s288_s16  }
   0xe   :  { %s289_s19 = smov [#allocation3]   ;;  %s290_s21 = smov [#allocation8]  }
   0xf   :  { %s17_s20 = sshll.u32 %s289_s19, 4  ;;  %s39_s22 = sshll.u32 %s290_s21, 4  ;;  %s18_s20 = int_to_ptr.vmem [resolvable:$true] %s17_s20  ;;  %s40_s22 = int_to_ptr.vmem [resolvable:$true] %s39_s22 }
  0x10   :  { %s228_s23 = scalar_lea.vmem %s18_s20, 128  ;;  %p233_p6 = scmp.lt.s32.totalorder %s18_s20, %s18_s20 }
  0x11   :  { %p229_p5 = scmp.ne.s32.totalorder %s18_s20, %s228_s23  ;;  %p234_p7 = scmp.lt.s32.totalorder %s228_s23, %s228_s23 }
  0x13   :  { %p235_p8 = por %p234_p7, %p233_p6 }
  0x15   :  { %p236_p9 = pnand %p235_p8, %p229_p5 }
  0x17   :  { %239 = shalt.err (!%p236_p9)
}
  0x18   :  { %20 = dma.hbm_to_vmem [thread:$0]  %s330_s0, 128, %s18_s20, [#allocation4]  }
  0x19   :  { %s248_s26 = scalar_lea.vmem %s40_s22, 128  ;;  %p253_p11 = scmp.lt.s32.totalorder %s40_s22, %s40_s22 }
  0x1a   :  { %p249_p10 = scmp.ne.s32.totalorder %s40_s22, %s248_s26  ;;  %p254_p12 = scmp.lt.s32.totalorder %s248_s26, %s248_s26 }
  0x1c   :  { %p255_p13 = por %p254_p12, %p253_p11 }
  0x1e   :  { %p256_p0 = pnand %p255_p13, %p249_p10 }
  0x20   :  { %259 = shalt.err (!%p256_p0)
}
  0x21   :  { %42 = dma.hbm_to_vmem [thread:$0]  %s332_s2, 128, %s40_s22, [#allocation7]  }
  0x22   :  { %280 = dma.done.wait [#allocation4], 128  }
  0x23   :  { %281 = vsyncadd [#allocation4], 4294967168 }
  0x24   :  { %282 = dma.done.wait [#allocation7], 640  }
  0x25   :  { %283 = vsyncadd [#allocation7], 4294966656  ;;  %vm56_vm0 = vcmask 261120   ;;  %v291_v0 = vmov 0.0   ;;  %vm292_vm1 = vmmov 0   ;;  %v63_v1 = vld [vmem:[#allocation6 + $0x18] sm:$0xff]  ;;  %v150_v14 = vlaneseq }
  0x26   :  { %181 = vmatprep.subr.mxu0 %v291_v0  ;;  %189 = vmatprep.mubr.msk.f32.mxu0 %vm292_vm1, %v291_v0  ;;  %57 = vst.msk [vmem:[#allocation2] sm:$0xff] %vm56_vm0, %v291_v0  ;;  %v62_v2 = vld [vmem:[#allocation6 + $0x10] sm:$0xff]  ;;  %v61_v3 = vld [vmem:[#allocation6 + $0x8] sm:$0xff]  ;;  %v60_v4 = vld [vmem:[#allocation6] sm:$0xff]  ;;  %s293_s0 = smov [#allocation9]   ;;  %vm157_vm2 = vcmask 57344  }
  0x27   :  { %182 = vmatpush3.msra.mxu0 %v63_v1  ;;  %v59_v5 = vld [vmem:[#allocation3] sm:$0xff]  ;;  %v143_v10 = vld [vmem:[#allocation8] sm:$0xff]  ;;  %v151_v15 = vand.u32 127, %v150_v14  ;;  %v153_v16 = vshrl.u32 %v150_v14, 7  ;;  %s165_s2 = sshll.u32 %s293_s0, 4  ;;  %s166_s2 = int_to_ptr.vmem [resolvable:$true] %s165_s2 }
  0x28   :  { %183 = vmatprep.subr.mxu0 %v291_v0  ;;  %s260_s28 = scalar_lea.vmem %s166_s2, 16  ;;  %s264_s29 = scalar_lea.vmem %s166_s2, 32 }
  0x29   :  { %184 = vmatpush3.msra.mxu0 %v62_v2  ;;  %v154_v17 = vsub.s32 %v151_v15, %v153_v16  ;;  %p261_p1 = scmp.ne.s32.totalorder %s166_s2, %s260_s28  ;;  %p265_p2 = scmp.lt.s32.totalorder %s166_s2, %s166_s2 }
  0x2a   :  { %185 = vmatprep.subr.mxu0 %v291_v0  ;;  %p266_p3 = scmp.lt.s32.totalorder %s264_s29, %s260_s28 }
  0x2b   :  { %186 = vmatpush3.msra.mxu0 %v61_v3 }
  0x2c   :  { %187 = vmatprep.subr.mxu0 %v291_v0  ;;  %p267_p4 = por %p266_p3, %p265_p2 }
  0x2d   :  { %188 = vmatpush3.msra.mxu0 %v60_v4  ;;  %v58_v6 = vld [vmem:[#allocation2] sm:$0xff] }
  0x2e   :  { %190 = vmatmul.mubr.msk.f32.vlgmr.msra.gmra.mxu0 %vm56_vm0, %v59_v5  ;;  %p268_p5 = pnand %p267_p4, %p261_p1 }
  0xee   :  { %v134_v7 = vpop.f32.mrf.mxu0 }
  0xef   :  { %v138_v8 = vadd.f32 %v134_v7, %v58_v6 }
  0xf0   :  { %v191_v9 = vpop.f32.mrf.mxu0 }
  0xf1   :  { %139 = vst.msk [vmem:[#allocation2] sm:$0xff] %vm56_vm0, %v138_v8 }
  0xf8   :  { %v144_v11 = vld [vmem:[#allocation2] sm:$0xff] }
  0xf9   :  { %v145_v12 = vmul.f32 %v144_v11, %v143_v10 }
  0xfb   :  { %v146_v13 = vsel %vm56_vm0, %v145_v12, 0.0 }
  0xfc   :  { %147 = vadd.xlane.f32.xlu0 %v146_v13 }
 0x185   :  { %v148_v18 = vpop.xlane.xlu0 %147 }
 0x186   :  { %v155_v19 = vrot.slane %v148_v18, %v154_v17 }
 0x188   :  { %158 = vst.msk [vmem:[#allocation9] sm:$0x1] %vm157_vm2, %v155_v19 }
 0x189   :  { %271 = shalt.err (!%p268_p5)
}
 0x18a   :  { %168 = dma.vmem_to_hbm [thread:$0]  %s166_s2, 16, %s333_s3, [#allocation5]  }
 0x18b   :  { %284 = dma.done.wait [#allocation5], 16  }
 0x18c   :  { %285 = vsyncadd [#allocation5], 4294967280 }
 0x18d   :  { %172 = vsyncpa [#allocation4], 1 }
 0x18e   :  { %173 = vsyncpa [#allocation7], 1 }
 0x18f   :  { %174 = vsyncpa [#allocation5], 1 }

</bundles_post_ra>
